<compile_context>
chip_gen: v5e
topology: v5e:2x2
jax: 0.10.0
libtpu: 0.0.40
codegen_flags: <defaults>
</compile_context>

<pallas_src>
import numpy as np
import jax
import jax.numpy as jnp
from jax.experimental import pallas as pl
from jax.experimental.pallas import tpu as pltpu


def _round_up(x: int, m: int) -> int:
    return ((x + m - 1) // m) * m


def _td_linear_kernel(x_ref, w_ref, b_ref, o_ref):
    # x_ref: (tm, Fp)   w_ref: (Fp, tn)   b_ref: (1, tn)   o_ref: (tm, tn)
    acc = jnp.dot(x_ref[...], w_ref[...], preferred_element_type=jnp.float32)
    o_ref[...] = (acc + b_ref[...].astype(jnp.float32)).astype(o_ref.dtype)


def _linear_pallas(c_in, w, b, *, compute_dtype=None):
    """y = c_in @ w + b, tiled over rows of c_in with a VMEM-resident weight."""
    M, F = c_in.shape
    Fw, H = w.shape
    assert F == Fw, (F, Fw)
    out_dtype = c_in.dtype

    # --- lane-dense / tile-aligned padded shapes --------------------------
    Fp = _round_up(F, 128)                    # contraction dim, lane-aligned
    Hp = _round_up(H, 128)                    # output lane dim
    tn = min(512, Hp)
    Hp = _round_up(Hp, tn)
    Mp = _round_up(M, 8)                      # sublane granularity
    tm = min(512, Mp)                         # 512-row streamed tiles
    Mp = _round_up(Mp, tm)

    x_p = c_in
    if (Mp, Fp) != (M, F):
        x_p = jnp.pad(c_in, ((0, Mp - M), (0, Fp - F)))
    w_p = w
    if (Fp, Hp) != (F, H):
        w_p = jnp.pad(w, ((0, Fp - F), (0, Hp - H)))
    b_p = b.reshape(1, H)
    if Hp != H:
        b_p = jnp.pad(b_p, ((0, 0), (0, Hp - H)))

    if compute_dtype is not None:             # e.g. jnp.bfloat16: halves x/w HBM bytes
        x_p = x_p.astype(compute_dtype)
        w_p = w_p.astype(compute_dtype)

    n_m = Mp // tm
    n_h = Hp // tn

    # --- specs -------------------------------------------------------------
    x_spec_kwargs = {}
    if n_m > 2:                               # deeper buffering only helps when streaming
        x_spec_kwargs["pipeline_mode"] = pl.Buffered(3)
    x_spec = pl.BlockSpec((tm, Fp), lambda j, i: (i, 0), **x_spec_kwargs)
    w_spec = pl.BlockSpec((Fp, tn), lambda j, i: (0, j))   # resident across inner M loop
    b_spec = pl.BlockSpec((1, tn), lambda j, i: (0, j))
    o_spec = pl.BlockSpec((tm, tn), lambda j, i: (i, j))

    in_itemsize = jnp.dtype(x_p.dtype).itemsize
    out_itemsize = jnp.dtype(out_dtype).itemsize
    # double-buffered x/out tiles + (double-buffer-counted) weight/bias, with headroom
    vmem_est = (2 * (tm * Fp * in_itemsize + tm * tn * out_itemsize)
                + 2 * (Fp * tn * in_itemsize + tn * 4))
    vmem_limit = int(min(max(4 * vmem_est, 16 * 1024 * 1024), 64 * 1024 * 1024))

    cost = pl.CostEstimate(
        flops=2 * Mp * Fp * Hp,
        transcendentals=0,
        bytes_accessed=(Mp * Fp + Fp * Hp) * in_itemsize
        + Hp * 4
        + Mp * Hp * out_itemsize,
    )

    out_p = pl.pallas_call(
        _td_linear_kernel,
        out_shape=jax.ShapeDtypeStruct((Mp, Hp), out_dtype),
        grid_spec=pltpu.PrefetchScalarGridSpec(
            num_scalar_prefetch=0,
            grid=(n_h, n_m),                  # H outer (weight resident), M inner (streamed)
            in_specs=[x_spec, w_spec, b_spec],
            out_specs=o_spec,
        ),
        compiler_params=pltpu.CompilerParams(
            dimension_semantics=("parallel", "parallel"),
            vmem_limit_bytes=vmem_limit,
        ),
        cost_estimate=cost,
    )(x_p, w_p, b_p)

    if (Mp, Hp) != (M, H):
        out_p = out_p[:M, :H]
    return out_p


def time_distributed_linear(x, w, b, *, batch_first=True, compute_dtype=None):
    """TimeDistributed(Linear) forward, matching the torch module exactly.

    x: (B, T, F) if batch_first else (T, B, F)
    w: (F, H)    b: (H,)
    """
    if batch_first:
        B, T, F = x.shape
    else:
        T, B, F = x.shape
    H = w.shape[1]

    c_in = x.reshape((B * T, F))              # row-major flatten (same as torch .reshape)
    c_out = _linear_pallas(c_in, w, b, compute_dtype=compute_dtype)
    r_in = c_out.reshape((B, T, H))
    if not batch_first:
        # Mirrors torch exactly: view(B, T, -1) then permute(1, 0, 2).
        # TODO(synk): this re-shuffle could be fused into the kernel out_spec
        # to save one output-sized HBM copy; kept in JAX to preserve the
        # original module's exact semantics.
        r_in = jnp.transpose(r_in, (1, 0, 2))
    return r_in


if __name__ == "__main__":
    key = jax.random.PRNGKey(0)
    kx, kw, kb, kx2, kx3 = jax.random.split(key, 5)

    # --- Small demo: batch_first=True -------------------------------------
    B, T, F, H = 2, 8, 32, 32
    x = jax.random.normal(kx, (B, T, F), dtype=jnp.float32)
    w = jax.random.normal(kw, (F, H), dtype=jnp.float32) * 0.05
    b = jax.random.normal(kb, (H,), dtype=jnp.float32) * 0.05

    out = time_distributed_linear(x, w, b, batch_first=True)
    out = jax.block_until_ready(out)
    assert out.shape == (B, T, H)
    ref = (np.asarray(x, np.float64).reshape(B * T, F) @ np.asarray(w, np.float64)
           + np.asarray(b, np.float64)).reshape(B, T, H)
    assert np.allclose(np.asarray(out, np.float64), ref, atol=1e-4, rtol=1e-4)

    # --- batch_first=False (replicates the torch reshape/permute exactly) --
    x_tbf = jax.random.normal(kx2, (T, B, F), dtype=jnp.float32)
    out_f = time_distributed_linear(x_tbf, w, b, batch_first=False)
    out_f = jax.block_until_ready(out_f)
    assert out_f.shape == (T, B, H)
    ref_f = (np.asarray(x_tbf, np.float64).reshape(B * T, F) @ np.asarray(w, np.float64)
             + np.asarray(b, np.float64)).reshape(B, T, H).transpose(1, 0, 2)
    assert np.allclose(np.asarray(out_f, np.float64), ref_f, atol=1e-4, rtol=1e-4)

    # --- Larger shape: exercises M tiling (grid > 1), F/H lane padding -----
    B2, T2, F2, H2 = 4, 300, 96, 160
    x2 = jax.random.normal(kx3, (B2, T2, F2), dtype=jnp.float32)
    w2 = jax.random.normal(kw, (F2, H2), dtype=jnp.float32) * 0.05
    b2 = jax.random.normal(kb, (H2,), dtype=jnp.float32) * 0.05
    out2 = time_distributed_linear(x2, w2, b2, batch_first=True)
    out2 = jax.block_until_ready(out2)
    assert out2.shape == (B2, T2, H2)
    ref2 = (np.asarray(x2, np.float64).reshape(B2 * T2, F2) @ np.asarray(w2, np.float64)
            + np.asarray(b2, np.float64)).reshape(B2, T2, H2)
    assert np.allclose(np.asarray(out2, np.float64), ref2, atol=1e-3, rtol=1e-3)

    print("KERNEL_OK")
</pallas_src>

<mosaic_0001>
module attributes {stable_mosaic.version = 11 : i64} {
  func.func @_td_linear_kernel(%arg0: i32, %arg1: i32, %arg2: memref<16x128xf32, #tpu.memory_space<vmem>>, %arg3: memref<128x128xf32, #tpu.memory_space<vmem>>, %arg4: memref<1x128xf32, #tpu.memory_space<vmem>>, %arg5: memref<16x128xf32, #tpu.memory_space<vmem>>) attributes {dimension_semantics = [#tpu.dimension_semantics<parallel>, #tpu.dimension_semantics<parallel>], iteration_bounds = array<i64: 1, 1>, scalar_prefetch = 0 : i64, scratch_operands = 0 : i64, tpu.core_type = #tpu.core_type<tc>, window_params = [{transform_indices = @transform_0, window_bounds = array<i64: 16, 128>}, {transform_indices = @transform_1, window_bounds = array<i64: 128, 128>}, {transform_indices = @transform_2, window_bounds = array<i64: 1, 128>}, {transform_indices = @transform_3, window_bounds = array<i64: 16, 128>}]} {
    %c0 = arith.constant 0 : index
    %c0_0 = arith.constant 0 : index
    %0 = vector.load %arg2[%c0, %c0_0] : memref<16x128xf32, #tpu.memory_space<vmem>>, vector<16x128xf32>
    %c0_1 = arith.constant 0 : index
    %c0_2 = arith.constant 0 : index
    %1 = vector.load %arg3[%c0_1, %c0_2] : memref<128x128xf32, #tpu.memory_space<vmem>>, vector<128x128xf32>
    %cst = arith.constant dense<0.000000e+00> : vector<16x128xf32>
    %2 = tpu.matmul %0, %1, %cst {dimension_numbers = #tpu.dot_dimension_numbers<[1], [0], [0], [1], [0, 0, 1, 1], [], []>} : vector<16x128xf32>, vector<128x128xf32>, vector<16x128xf32> -> vector<16x128xf32>
    %c0_3 = arith.constant 0 : index
    %c0_4 = arith.constant 0 : index
    %3 = vector.load %arg4[%c0_3, %c0_4] : memref<1x128xf32, #tpu.memory_space<vmem>>, vector<1x128xf32>
    %4 = vector.broadcast %3 : vector<1x128xf32> to vector<16x128xf32>
    %5 = arith.addf %2, %4 : vector<16x128xf32>
    %c0_5 = arith.constant 0 : index
    %c0_6 = arith.constant 0 : index
    %6 = vector.load %arg5[%c0_5, %c0_6] : memref<16x128xf32, #tpu.memory_space<vmem>>, vector<16x128xf32>
    tpu.vector_store %arg5[%c0_5, %c0_6], %5 {strides = array<i32>} : memref<16x128xf32, #tpu.memory_space<vmem>>, vector<16x128xf32>,
    return
  }
  func.func @transform_0(%arg0: i32, %arg1: i32) -> (i32, i32) {
    %c0_i32 = arith.constant 0 : i32
    %c0_i32_0 = arith.constant 0 : i32
    return %arg1, %c0_i32 : i32, i32
  }
  func.func @transform_1(%arg0: i32, %arg1: i32) -> (i32, i32) {
    %c0_i32 = arith.constant 0 : i32
    %c0_i32_0 = arith.constant 0 : i32
    return %c0_i32, %arg0 : i32, i32
  }
  func.func @transform_2(%arg0: i32, %arg1: i32) -> (i32, i32) {
    %c0_i32 = arith.constant 0 : i32
    %c0_i32_0 = arith.constant 0 : i32
    return %c0_i32, %arg0 : i32, i32
  }
  func.func @transform_3(%arg0: i32, %arg1: i32) -> (i32, i32) {
    %c0_i32 = arith.constant 0 : i32
    return %arg1, %arg0 : i32, i32
  }
}

</mosaic_0001>

<bundles_post_ra>
// kernel: tpu_custom_call.1
= control target key start
LH: loop header
LB: loop body
LE: loop exit
PB: predicated region body
PF: predicated region fallthrough
CT: control target
= control target key end

     0   :  { %8 = vsyncpa [#allocation3], 0  ;;  %s260_s0 = inlined_call_operand.hbm [shape: f32[16,128], index: 0, kind: input, shape index: {}]   ;;  %s261_s1 = inlined_call_operand.hbm [shape: f32[128,128], index: 1, kind: input, shape index: {}]   ;;  %s262_s2 = inlined_call_operand.vmem [shape: f32[1,128], index: 2, kind: input, shape index: {}]   ;;  %s263_s3 = inlined_call_operand.hbm [shape: f32[16,128], index: 3, kind: output, shape index: {}]  }
   0x1   :  { %9 = vsyncpa [#allocation6], 0 }
   0x2   :  { %10 = vsyncpa [#allocation4], 0  ;;  %s15_s14 = sshll.u32 %s260_s0, 4  ;;  %s214_s15 = smov [#allocation2]   ;;  %s16_s14 = int_to_ptr.hbm [resolvable:$true] %s15_s14 }
   0x3   :  { %s17_s16 = sshll.u32 %s214_s15, 4  ;;  %s28_s19 = sshll.u32 %s261_s1, 4  ;;  %s18_s16 = int_to_ptr.vmem [resolvable:$true] %s17_s16  ;;  %s29_s19 = int_to_ptr.hbm [resolvable:$true] %s28_s19 }
   0x4   :  { %s215_s20 = smov 128   ;;  %s216_s21 = smov 8  }
   0x5   :  { %23 = dma.hbm_to_vmem [thread:$0]  %s16_s14, 256, %s18_s16, [#allocation3], %s215_s20, %s215_s20, %s216_s21  }
   0x6   :  { %s217_s22 = smov [#allocation5]  }
   0x7   :  { %s30_s23 = sshll.u32 %s217_s22, 4  ;;  %s31_s23 = int_to_ptr.vmem [resolvable:$true] %s30_s23 }
   0x8   :  { %36 = dma.hbm_to_vmem [thread:$0]  %s29_s19, 2048, %s31_s23, [#allocation6], %s215_s20, %s215_s20, %s216_s21  }
   0x9   :  { %208 = dma.done.wait [#allocation3], 256  }
   0xa   :  { %209 = vsyncadd [#allocation3], 4294967040 }
   0xb   :  { %210 = dma.done.wait [#allocation6], 2048  }
   0xc   :  { %211 = vsyncadd [#allocation6], 4294965248  ;;  %v64_v0 = vld [vmem:[#allocation5 + $0x78] sm:$0xff]  ;;  %v63_v1 = vld [vmem:[#allocation5 + $0x70] sm:$0xff]  ;;  %s218_s24 = smov [#allocation7]   ;;  %s100_s28 = sshll.u32 %s263_s3, 4  ;;  %s101_s28 = int_to_ptr.hbm [resolvable:$true] %s100_s28 }
   0xd   :  { %69 = vmatpush.msra.mxu0 %v64_v0  ;;  %114 = vmatpush.msra.mxu1 %v64_v0  ;;  %v62_v2 = vld [vmem:[#allocation5 + $0x68] sm:$0xff]  ;;  %v61_v3 = vld [vmem:[#allocation5 + $0x60] sm:$0xff]  ;;  %v60_v4 = vld [vmem:[#allocation5 + $0x58] sm:$0xff]  ;;  %s98_s25 = sshll.u32 %s218_s24, 4  ;;  %s99_s25 = int_to_ptr.vmem [resolvable:$true] %s98_s25 }
   0xe   :  { %v59_v5 = vld [vmem:[#allocation5 + $0x50] sm:$0xff]  ;;  %v58_v6 = vld [vmem:[#allocation5 + $0x48] sm:$0xff]  ;;  %v57_v7 = vld [vmem:[#allocation5 + $0x40] sm:$0xff] }
   0xf   :  { %70 = vmatpush.msra.mxu0 %v63_v1  ;;  %115 = vmatpush.msra.mxu1 %v63_v1  ;;  %v56_v8 = vld [vmem:[#allocation5 + $0x38] sm:$0xff]  ;;  %v55_v9 = vld [vmem:[#allocation5 + $0x30] sm:$0xff]  ;;  %v54_v10 = vld [vmem:[#allocation5 + $0x28] sm:$0xff] }
  0x10   :  { %v53_v11 = vld [vmem:[#allocation5 + $0x20] sm:$0xff]  ;;  %v52_v12 = vld [vmem:[#allocation5 + $0x18] sm:$0xff]  ;;  %v51_v13 = vld [vmem:[#allocation5 + $0x10] sm:$0xff] }
  0x11   :  { %71 = vmatpush.msra.mxu0 %v62_v2  ;;  %116 = vmatpush.msra.mxu1 %v62_v2  ;;  %v50_v14 = vld [vmem:[#allocation5 + $0x8] sm:$0xff]  ;;  %v49_v15 = vld [vmem:[#allocation5] sm:$0xff]  ;;  %v47_v16 = vld [vmem:[#allocation2] sm:$0xff] }
  0x12   :  { %v48_v17 = vld [vmem:[#allocation2 + $0x8] sm:$0xff]  ;;  %v135_v18 = vld [vmem:[%s262_s2] ss:$0 sm:$0xff] }
  0x13   :  { %72 = vmatpush.msra.mxu0 %v61_v3  ;;  %117 = vmatpush.msra.mxu1 %v61_v3 }
  0x15   :  { %73 = vmatpush.msra.mxu0 %v60_v4  ;;  %118 = vmatpush.msra.mxu1 %v60_v4 }
  0x17   :  { %74 = vmatpush.msra.mxu0 %v59_v5  ;;  %119 = vmatpush.msra.mxu1 %v59_v5 }
  0x19   :  { %75 = vmatpush.msra.mxu0 %v58_v6  ;;  %120 = vmatpush.msra.mxu1 %v58_v6 }
  0x1b   :  { %76 = vmatpush.msra.mxu0 %v57_v7  ;;  %121 = vmatpush.msra.mxu1 %v57_v7 }
  0x1d   :  { %77 = vmatpush.msra.mxu0 %v56_v8  ;;  %122 = vmatpush.msra.mxu1 %v56_v8 }
  0x1f   :  { %78 = vmatpush.msra.mxu0 %v55_v9  ;;  %123 = vmatpush.msra.mxu1 %v55_v9 }
  0x21   :  { %79 = vmatpush.msra.mxu0 %v54_v10  ;;  %124 = vmatpush.msra.mxu1 %v54_v10 }
  0x23   :  { %80 = vmatpush.msra.mxu0 %v53_v11  ;;  %125 = vmatpush.msra.mxu1 %v53_v11 }
  0x25   :  { %81 = vmatpush.msra.mxu0 %v52_v12  ;;  %126 = vmatpush.msra.mxu1 %v52_v12 }
  0x27   :  { %82 = vmatpush.msra.mxu0 %v51_v13  ;;  %127 = vmatpush.msra.mxu1 %v51_v13 }
  0x29   :  { %83 = vmatpush.msra.mxu0 %v50_v14  ;;  %128 = vmatpush.msra.mxu1 %v50_v14 }
  0x2b   :  { %84 = vmatpush.msra.mxu0 %v49_v15  ;;  %129 = vmatpush.msra.mxu1 %v49_v15 }
  0x2c   :  { %85 = vmatmul.f32.vlgmr.msra.gmra.mxu0 %v47_v16  ;;  %88 = vmatmul.f32.vlgmr.msra.gmra.mxu1 %v48_v17 }
  0xa9   :  { %v86_v19 = vpop.f32.mrf.mxu0  ;;  %v89_v20 = vpop.f32.mrf.mxu1 }
  0xaa   :  { %v87_v21 = vadd.f32 %v135_v18, %v86_v19  ;;  %v90_v22 = vadd.f32 %v135_v18, %v89_v20 }
  0xac   :  { %92 = vst [vmem:[#allocation7] sm:$0xff] %v87_v21 }
  0xad   :  { %93 = vst [vmem:[#allocation7 + $0x8] sm:$0xff] %v90_v22 }
  0xae   :  { %106 = dma.vmem_to_hbm [thread:$0]  %s99_s25, 256, %s101_s28, [#allocation4], %s215_s20, %s215_s20, %s216_s21  }
  0xaf   :  { %212 = dma.done.wait [#allocation4], 256  }
  0xb0   :  { %213 = vsyncadd [#allocation4], 4294967040 }
  0xb1   :  { %111 = vsyncpa [#allocation3], 1 }
  0xb2   :  { %112 = vsyncpa [#allocation6], 1 }
  0xb3   :  { %113 = vsyncpa [#allocation4], 1 }

</bundles_post_ra>
